<compile_context>
chip_gen: v6e
topology: v6e:2x2x1
jax: 0.10.0
libtpu: 0.0.40
codegen_flags: <defaults>
</compile_context>

<pallas_src>
import jax
import jax.numpy as jnp
from jax.experimental import pallas as pl
from jax.experimental.pallas import tpu as pltpu


def _round_up(x, m):
    return (x + m - 1) // m * m


def _patch_embed_kernel(x_ref, w_ref, b_ref, o_ref):
    # x_ref: (tm, K)  w_ref: (K, E_pad)  b_ref: (1, E_pad) f32  o_ref: (tm, E_pad)
    acc = jnp.dot(x_ref[...], w_ref[...], preferred_element_type=jnp.float32)
    o_ref[...] = (acc + b_ref[...]).astype(o_ref.dtype)


def _vmem_budgets():
    """Generation-aware VMEM budgeting.

    Returns (tile_budget, vmem_limit_bytes):
      * 3/4 of physical VMEM is requested as the scoped limit (96 MiB on
        v5e/v6e's 128 MiB, 48 MiB on v7x's 64 MiB per TC), leaving headroom
        for Mosaic internal scratch.
      * tile_budget = limit minus an 8 MiB safety margin; used to size the
        double-buffered pipeline.
    """
    try:
        cap = int(pltpu.get_tpu_info().vmem_capacity_bytes)
    except Exception:
        cap = 64 * 1024 * 1024  # conservative fallback (v7x per-TC VMEM)
    vmem_limit = (cap * 3) // 4
    tile_budget = max(vmem_limit - 8 * 1024 * 1024, 16 * 1024 * 1024)
    return tile_budget, vmem_limit


def _choose_row_tile(K, E_pad, in_bytes, out_bytes, tile_budget):
    """Largest row tile whose double-buffered pipeline fits the VMEM budget."""
    k_lanes = max(_round_up(K, 128), 128)   # lhs lane dim pads to a full vreg
    k_sub = _round_up(K, 8)
    # Resident weight + bias (constant index map; conservatively count the
    # double buffer Pallas still allocates for them).
    fixed = 2 * k_sub * E_pad * in_bytes + 2 * 8 * E_pad * 4
    # When the output is narrower than f32, the f32 matmul accumulator is a
    # separate VMEM temp — budget it (single-buffered) so v7x never OOMs.
    acc_bytes = 4 if out_bytes < 4 else 0
    for tm in (4096, 2048, 1024, 512, 256, 128, 64, 32, 16, 8):
        need = (fixed
                + 2 * tm * k_lanes * in_bytes     # input double buffer
                + 2 * tm * E_pad * out_bytes      # output double buffer
                + tm * E_pad * acc_bytes)         # f32 accumulator temp
        if need <= tile_budget:
            return tm
    return 8


def patch_embed_mr(x, weight, bias, patch_size, *, out_dtype=None,
                   compute_dtype=None, row_tile=None):
    """Forward pass of PatchEmbedMR.

    Args:
      x:      (B, C, H, W)  NCHW, same convention as the PyTorch module.
      weight: (E, C, p, p)  nn.Conv2d weight layout.
      bias:   (E,)
      out_dtype: dtype of the returned activations (default x.dtype).  Passing
        jnp.bfloat16 halves the dominant HBM write stream (~1.8x wall clock);
        accumulation stays f32 inside the kernel.
      compute_dtype: optional dtype for the GEMM operands.  Only shrinks the
        small (N, K) input stream (<1% of traffic for real OmniGen E), so
        leave it at the default unless the model is already bf16 end-to-end
        (on v5e in particular it buys nothing).
      row_tile: optional override of the row tile (testing / tuning).
    Returns:
      (B, H//p * W//p, E) in out_dtype.
    """
    B, C, H, W = x.shape
    E = weight.shape[0]
    p = patch_size
    Hp, Wp = H // p, W // p
    N = B * Hp * Wp
    K = C * p * p

    if out_dtype is None:
        out_dtype = x.dtype
    if compute_dtype is None:
        compute_dtype = x.dtype

    # Conv2d with stride == kernel_size silently drops trailing rows/cols
    # (VALID semantics); mirror that before the patch reshape.
    if H != Hp * p or W != Wp * p:
        x = x[:, :, :Hp * p, :Wp * p]

    # --- glue: extract non-overlapping patches, flatten in (c, ki, kj) order
    # to match Conv2d's OIHW weight layout (E, C, p, p).
    patches = x.reshape(B, C, Hp, p, Wp, p)
    patches = patches.transpose(0, 2, 4, 1, 3, 5)          # (B, Hp, Wp, C, p, p)
    patches = patches.reshape(N, K).astype(compute_dtype)  # (N, K)

    w_mat = weight.reshape(E, K).T.astype(compute_dtype)   # (K, E)
    b_mat = bias.reshape(1, E).astype(jnp.float32)         # bias added in f32 acc

    in_bytes = jnp.dtype(compute_dtype).itemsize
    out_bytes = jnp.dtype(out_dtype).itemsize

    # --- lane-dense output: pad E up to a multiple of 128 (unmasked vst).
    # Real OmniGen E (2048/3072) already satisfies this; only tiny prototyping
    # configs pay the [:, :E] slice below.
    E_pad = _round_up(E, 128)
    if E_pad != E:
        w_mat = jnp.pad(w_mat, ((0, 0), (0, E_pad - E)))
        b_mat = jnp.pad(b_mat, ((0, 0), (0, E_pad - E)))

    # --- row tile: largest VMEM-legal tile for this TPU generation, sublane
    # aligned, clamped to the problem size.
    tile_budget, vmem_limit = _vmem_budgets()
    tm = row_tile if row_tile is not None else _choose_row_tile(
        K, E_pad, in_bytes, out_bytes, tile_budget)
    tm = max(8, min(_round_up(tm, 8), _round_up(N, 8)))

    # --- ragged N: no padding, no output slice.  Pallas clips the partial
    # last block's DMAs: rows past N read garbage into VMEM but the matching
    # output rows are masked on store.  Safe because the body is purely
    # row-wise (do NOT add any cross-row reduction / in-place accumulation).
    grid = (pl.cdiv(N, tm),)

    cost = pl.CostEstimate(
        flops=2 * N * K * E_pad,
        transcendentals=0,
        bytes_accessed=(N * K * in_bytes           # patches
                        + K * E_pad * in_bytes     # weight
                        + E_pad * 4                # bias
                        + N * E_pad * out_bytes),  # output (dominant term)
    )

    out = pl.pallas_call(
        _patch_embed_kernel,
        out_shape=jax.ShapeDtypeStruct((N, E_pad), out_dtype),
        grid_spec=pltpu.PrefetchScalarGridSpec(
            num_scalar_prefetch=0,
            grid=grid,
            in_specs=[
                pl.BlockSpec((tm, K), lambda i: (i, 0)),       # patches tile
                pl.BlockSpec((K, E_pad), lambda i: (0, 0)),    # resident weight
                pl.BlockSpec((1, E_pad), lambda i: (0, 0)),    # resident bias
            ],
            out_specs=pl.BlockSpec((tm, E_pad), lambda i: (i, 0)),
        ),
        compiler_params=pltpu.CompilerParams(
            dimension_semantics=("parallel",),   # shards across v7x's 2 TCs
            vmem_limit_bytes=vmem_limit,
        ),
        cost_estimate=cost,
    )(patches, w_mat, b_mat)

    if E_pad != E:
        out = out[:, :E]
    return out.reshape(B, Hp * Wp, E)


def _reference(x, weight, bias, patch_size):
    # Pure-JAX reference: strided conv (NCHW, OIHW) then flatten(2).transpose(1,2).
    y = jax.lax.conv_general_dilated(
        x, weight,
        window_strides=(patch_size, patch_size),
        padding="VALID",
        dimension_numbers=("NCHW", "OIHW", "NCHW"),
    )
    y = y + bias.reshape(1, -1, 1, 1)
    B, E, Hp, Wp = y.shape
    return y.reshape(B, E, Hp * Wp).transpose(0, 2, 1)


if __name__ == "__main__":
    # Small shapes consistent with the module's forward.
    B, C, H, W = 2, 4, 16, 16
    patch_size = 2
    embed_dim = 32

    key = jax.random.PRNGKey(0)
    kx, kw, kb = jax.random.split(key, 3)

    x = jax.random.normal(kx, (B, C, H, W), dtype=jnp.float32)
    # Deterministic synthetic parameters (Conv2d shapes: (E, C, p, p), (E,)).
    weight = 0.05 * jax.random.normal(
        kw, (embed_dim, C, patch_size, patch_size), dtype=jnp.float32)
    bias = 0.1 * jax.random.normal(kb, (embed_dim,), dtype=jnp.float32)

    ref = _reference(x, weight, bias, patch_size)
    expected_shape = (B, (H // patch_size) * (W // patch_size), embed_dim)

    # 1) default f32 path, full tile (N divides tm).
    out = jax.block_until_ready(patch_embed_mr(x, weight, bias, patch_size))
    assert out.shape == expected_shape
    assert jnp.allclose(out, ref, atol=1e-5, rtol=1e-5)

    # 2) ragged-N path: force a row tile that does not divide N so the partial
    #    last block (clipped DMAs + masked store) is exercised on hardware.
    out_ragged = jax.block_until_ready(
        patch_embed_mr(x, weight, bias, patch_size, row_tile=48))
    assert out_ragged.shape == expected_shape
    assert jnp.allclose(out_ragged, ref, atol=1e-5, rtol=1e-5)

    # 3) bf16 output path (halves the dominant HBM write stream); f32 accum,
    #    so only the final cast loses precision.
    out_bf16 = jax.block_until_ready(
        patch_embed_mr(x, weight, bias, patch_size, out_dtype=jnp.bfloat16))
    assert out_bf16.shape == expected_shape
    assert out_bf16.dtype == jnp.bfloat16
    assert jnp.allclose(out_bf16.astype(jnp.float32), ref, atol=3e-2, rtol=3e-2)

    print("KERNEL_OK")
</pallas_src>

<mosaic_0001>
module attributes {stable_mosaic.version = 11 : i64} {
  func.func @_patch_embed_kernel(%arg0: i32, %arg1: memref<128x16xf32, #tpu.memory_space<vmem>>, %arg2: memref<16x128xf32, #tpu.memory_space<vmem>>, %arg3: memref<1x128xf32, #tpu.memory_space<vmem>>, %arg4: memref<128x128xf32, #tpu.memory_space<vmem>>) attributes {dimension_semantics = [#tpu.dimension_semantics<parallel>], iteration_bounds = array<i64: 1>, scalar_prefetch = 0 : i64, scratch_operands = 0 : i64, tpu.core_type = #tpu.core_type<tc>, window_params = [{transform_indices = @transform_0, window_bounds = array<i64: 128, 16>}, {pipeline_mode = #tpu.pipeline_mode<synchronous>, transform_indices = @transform_1, window_bounds = array<i64: 16, 128>}, {pipeline_mode = #tpu.pipeline_mode<synchronous>, transform_indices = @transform_2, window_bounds = array<i64: 1, 128>}, {transform_indices = @transform_3, window_bounds = array<i64: 128, 128>}]} {
    %c0 = arith.constant 0 : index
    %c0_0 = arith.constant 0 : index
    %0 = vector.load %arg1[%c0, %c0_0] : memref<128x16xf32, #tpu.memory_space<vmem>>, vector<128x16xf32>
    %c0_1 = arith.constant 0 : index
    %c0_2 = arith.constant 0 : index
    %1 = vector.load %arg2[%c0_1, %c0_2] : memref<16x128xf32, #tpu.memory_space<vmem>>, vector<16x128xf32>
    %cst = arith.constant dense<0.000000e+00> : vector<128x128xf32>
    %2 = tpu.matmul %0, %1, %cst {dimension_numbers = #tpu.dot_dimension_numbers<[1], [0], [0], [1], [0, 0, 1, 1], [], []>} : vector<128x16xf32>, vector<16x128xf32>, vector<128x128xf32> -> vector<128x128xf32>
    %c0_3 = arith.constant 0 : index
    %c0_4 = arith.constant 0 : index
    %3 = vector.load %arg3[%c0_3, %c0_4] : memref<1x128xf32, #tpu.memory_space<vmem>>, vector<1x128xf32>
    %4 = vector.broadcast %3 : vector<1x128xf32> to vector<128x128xf32>
    %5 = arith.addf %2, %4 : vector<128x128xf32>
    %c0_5 = arith.constant 0 : index
    %c0_6 = arith.constant 0 : index
    %6 = vector.load %arg4[%c0_5, %c0_6] : memref<128x128xf32, #tpu.memory_space<vmem>>, vector<128x128xf32>
    tpu.vector_store %arg4[%c0_5, %c0_6], %5 {strides = array<i32>} : memref<128x128xf32, #tpu.memory_space<vmem>>, vector<128x128xf32>,
    return
  }
  func.func @transform_0(%arg0: i32) -> (i32, i32) {
    %c0_i32 = arith.constant 0 : i32
    %c0_i32_0 = arith.constant 0 : i32
    return %arg0, %c0_i32 : i32, i32
  }
  func.func @transform_1(%arg0: i32) -> (i32, i32) {
    %c0_i32 = arith.constant 0 : i32
    %c0_i32_0 = arith.constant 0 : i32
    %c0_i32_1 = arith.constant 0 : i32
    return %c0_i32, %c0_i32_0 : i32, i32
  }
  func.func @transform_2(%arg0: i32) -> (i32, i32) {
    %c0_i32 = arith.constant 0 : i32
    %c0_i32_0 = arith.constant 0 : i32
    %c0_i32_1 = arith.constant 0 : i32
    return %c0_i32, %c0_i32_0 : i32, i32
  }
  func.func @transform_3(%arg0: i32) -> (i32, i32) {
    %c0_i32 = arith.constant 0 : i32
    %c0_i32_0 = arith.constant 0 : i32
    return %arg0, %c0_i32 : i32, i32
  }
}

</mosaic_0001>

<bundles_post_ra>
// kernel: tpu_custom_call.1
= control target key start
LH: loop header
LB: loop body
LE: loop exit
PB: predicated region body
PF: predicated region fallthrough
CT: control target
= control target key end

     0   :  { %vm40_vm0 = vcmask 130048   ;;  %s457_s0 = inlined_call_operand.vmem [shape: f32[128,16], index: 0, kind: input, shape index: {}]   ;;  %s458_s1 = inlined_call_operand.vmem [shape: f32[16,128], index: 1, kind: input, shape index: {}]   ;;  %s459_s2 = inlined_call_operand.vmem [shape: f32[1,128], index: 2, kind: input, shape index: {}]   ;;  %s460_s3 = inlined_call_operand.hbm [shape: f32[128,128], index: 3, kind: output, shape index: {}]  }
   0x1   :  { %v32_v0 = vld [vmem:[%s458_s1 + $0x8] sm:$0xff]  ;;  %v31_v1 = vld [vmem:[%s458_s1] sm:$0xff]  ;;  %v17_v6 = vld [vmem:[%s457_s0 + $0x10] sm:$0xff] }
   0x2   :  { %301 = vmatprep.subr.mxu0 %v32_v0  ;;  %329 = vmatprep.subr.mxu1 %v32_v0  ;;  %v15_v2 = vld [vmem:[%s457_s0] sm:$0xff]  ;;  %v16_v4 = vld [vmem:[%s457_s0 + $0x8] sm:$0xff]  ;;  %v25_v7 = vld [vmem:[%s457_s0 + $0x50] sm:$0xff] }
   0x3   :  { %302 = vmatpush3.msra.mxu0 %v32_v0  ;;  %331 = vmatpush3.msra.mxu1 %v32_v0  ;;  %v23_v3 = vld [vmem:[%s457_s0 + $0x40] sm:$0xff]  ;;  %v24_v5 = vld [vmem:[%s457_s0 + $0x48] sm:$0xff] }
   0x4   :  { %303 = vmatprep.subr.mxu0 %v31_v1  ;;  %330 = vmatprep.subr.mxu1 %v31_v1 }
   0x5   :  { %304 = vmatpush3.msra.mxu0 %v31_v1  ;;  %332 = vmatpush3.msra.mxu1 %v31_v1 }
   0x6   :  { %305 = vmatprep.mubr.msk.f32.mxu0 %vm40_vm0, %v15_v2  ;;  %317 = vmatprep.mubr.msk.f32.mxu1 %vm40_vm0, %v23_v3 }
   0x7   :  { %306 = vmatmul.mubr.msk.f32.vlgmr.msra.gmra.mxu0 %vm40_vm0, %v16_v4  ;;  %318 = vmatmul.mubr.msk.f32.vlgmr.msra.gmra.mxu1 %vm40_vm0, %v24_v5 }
   0x8   :  { %8 = vsyncpa [#allocation3], 0  ;;  %308 = vmatprep.mubr.msk.f32.mxu0 %vm40_vm0, %v17_v6  ;;  %320 = vmatprep.mubr.msk.f32.mxu1 %vm40_vm0, %v25_v7  ;;  %v18_v8 = vld [vmem:[%s457_s0 + $0x18] sm:$0xff]  ;;  %v19_v10 = vld [vmem:[%s457_s0 + $0x20] sm:$0xff] }
   0x9   :  { %v26_v9 = vld [vmem:[%s457_s0 + $0x58] sm:$0xff]  ;;  %v27_v11 = vld [vmem:[%s457_s0 + $0x60] sm:$0xff]  ;;  %v20_v12 = vld [vmem:[%s457_s0 + $0x28] sm:$0xff] }
   0xa   :  { %v28_v13 = vld [vmem:[%s457_s0 + $0x68] sm:$0xff]  ;;  %v21_v14 = vld [vmem:[%s457_s0 + $0x30] sm:$0xff]  ;;  %v22_v16 = vld [vmem:[%s457_s0 + $0x38] sm:$0xff] }
   0xb   :  { %309 = vmatmul.mubr.msk.f32.gmra.mxu0 %vm40_vm0, %v18_v8  ;;  %321 = vmatmul.mubr.msk.f32.gmra.mxu1 %vm40_vm0, %v26_v9  ;;  %v29_v15 = vld [vmem:[%s457_s0 + $0x70] sm:$0xff]  ;;  %v30_v17 = vld [vmem:[%s457_s0 + $0x78] sm:$0xff]  ;;  %v266_v18 = vld [vmem:[%s459_s2] ss:$0 sm:$0xff]  ;;  %s358_s0 = smov [#allocation2]  }
   0xc   :  { %311 = vmatprep.mubr.msk.f32.mxu0 %vm40_vm0, %v19_v10  ;;  %323 = vmatprep.mubr.msk.f32.mxu1 %vm40_vm0, %v27_v11  ;;  %s255_s2 = sshll.u32 %s358_s0, 4  ;;  %s256_s2 = int_to_ptr.vmem [resolvable:$true] %s255_s2 }
   0xd   :  { %s336_s1 = scalar_lea.vmem %s256_s2, 2048  ;;  %p341_p1 = scmp.lt.s32.totalorder %s256_s2, %s256_s2 }
   0xe   :  { %p337_p0 = scmp.ne.s32.totalorder %s256_s2, %s336_s1  ;;  %p342_p2 = scmp.lt.s32.totalorder %s336_s1, %s336_s1 }
   0xf   :  { %312 = vmatmul.mubr.msk.f32.gmra.mxu0 %vm40_vm0, %v20_v12  ;;  %324 = vmatmul.mubr.msk.f32.gmra.mxu1 %vm40_vm0, %v28_v13 }
  0x10   :  { %314 = vmatprep.mubr.msk.f32.mxu0 %vm40_vm0, %v21_v14  ;;  %326 = vmatprep.mubr.msk.f32.mxu1 %vm40_vm0, %v29_v15  ;;  %p343_p3 = por %p342_p2, %p341_p1 }
  0x12   :  { %p344_p4 = pnand %p343_p3, %p337_p0 }
  0x13   :  { %315 = vmatmul.mubr.msk.f32.gmra.mxu0 %vm40_vm0, %v22_v16  ;;  %327 = vmatmul.mubr.msk.f32.gmra.mxu1 %vm40_vm0, %v30_v17 }
  0xc7   :  { %v307_v19 = vpop.f32.mrf.mxu0  ;;  %v319_v20 = vpop.f32.mrf.mxu1 }
  0xc8   :  { %v161_v21 = vadd.f32 %v307_v19, %v266_v18  ;;  %v201_v22 = vadd.f32 %v319_v20, %v266_v18 }
  0xc9   :  { %v155_v23 = vpop.f32.mrf.mxu0  ;;  %v195_v24 = vpop.f32.mrf.mxu1 }
  0xca   :  { %235 = vst [vmem:[#allocation2 + $0x8] sm:$0xff] %v161_v21  ;;  %243 = vst [vmem:[#allocation2 + $0x48] sm:$0xff] %v201_v22  ;;  %v156_v25 = vadd.f32 %v266_v18, %v155_v23  ;;  %v196_v26 = vadd.f32 %v266_v18, %v195_v24 }
  0xcb   :  { %v310_v27 = vpop.f32.mrf.mxu0  ;;  %v322_v28 = vpop.f32.mrf.mxu1 }
  0xcc   :  { %234 = vst [vmem:[#allocation2] sm:$0xff] %v156_v25  ;;  %242 = vst [vmem:[#allocation2 + $0x40] sm:$0xff] %v196_v26  ;;  %v171_v29 = vadd.f32 %v310_v27, %v266_v18  ;;  %v211_v30 = vadd.f32 %v322_v28, %v266_v18 }
  0xcd   :  { %v165_v31 = vpop.f32.mrf.mxu0  ;;  %v205_v32 = vpop.f32.mrf.mxu1 }
  0xce   :  { %237 = vst [vmem:[#allocation2 + $0x18] sm:$0xff] %v171_v29  ;;  %245 = vst [vmem:[#allocation2 + $0x58] sm:$0xff] %v211_v30  ;;  %v166_v33 = vadd.f32 %v266_v18, %v165_v31  ;;  %v206_v34 = vadd.f32 %v266_v18, %v205_v32 }
  0xcf   :  { %v313_v35 = vpop.f32.mrf.mxu0  ;;  %v325_v36 = vpop.f32.mrf.mxu1 }
  0xd0   :  { %236 = vst [vmem:[#allocation2 + $0x10] sm:$0xff] %v166_v33  ;;  %244 = vst [vmem:[#allocation2 + $0x50] sm:$0xff] %v206_v34  ;;  %v181_v37 = vadd.f32 %v313_v35, %v266_v18  ;;  %v221_v38 = vadd.f32 %v325_v36, %v266_v18 }
  0xd1   :  { %v175_v39 = vpop.f32.mrf.mxu0  ;;  %v215_v40 = vpop.f32.mrf.mxu1 }
  0xd2   :  { %239 = vst [vmem:[#allocation2 + $0x28] sm:$0xff] %v181_v37  ;;  %247 = vst [vmem:[#allocation2 + $0x68] sm:$0xff] %v221_v38  ;;  %v176_v41 = vadd.f32 %v266_v18, %v175_v39  ;;  %v216_v42 = vadd.f32 %v266_v18, %v215_v40 }
  0xd3   :  { %v316_v43 = vpop.f32.mrf.mxu0  ;;  %v328_v44 = vpop.f32.mrf.mxu1 }
  0xd4   :  { %238 = vst [vmem:[#allocation2 + $0x20] sm:$0xff] %v176_v41  ;;  %246 = vst [vmem:[#allocation2 + $0x60] sm:$0xff] %v216_v42  ;;  %v191_v45 = vadd.f32 %v316_v43, %v266_v18  ;;  %v231_v46 = vadd.f32 %v328_v44, %v266_v18 }
  0xd5   :  { %v185_v47 = vpop.f32.mrf.mxu0  ;;  %v225_v48 = vpop.f32.mrf.mxu1 }
  0xd6   :  { %241 = vst [vmem:[#allocation2 + $0x38] sm:$0xff] %v191_v45  ;;  %249 = vst [vmem:[#allocation2 + $0x78] sm:$0xff] %v231_v46  ;;  %v186_v49 = vadd.f32 %v266_v18, %v185_v47  ;;  %v226_v50 = vadd.f32 %v266_v18, %v225_v48 }
  0xd8   :  { %240 = vst [vmem:[#allocation2 + $0x30] sm:$0xff] %v186_v49  ;;  %248 = vst [vmem:[#allocation2 + $0x70] sm:$0xff] %v226_v50 }
  0xd9   :  { %347 = shalt.err (!%p344_p4)
}
  0xda   :  { %s359_s22 = smov 128   ;;  %s360_s23 = smov 8  }
  0xdb   :  { %261 = dma.vmem_to_hbm [thread:$0]  %s256_s2, 2048, %s460_s3, [#allocation3], %s359_s22, %s359_s22, %s360_s23  }
  0xdc   :  { %356 = dma.done.wait [#allocation3], 2048  }
  0xdd   :  { %357 = vsyncadd [#allocation3], 4294965248 }
  0xde   :  { %265 = vsyncpa [#allocation3], 1 }

</bundles_post_ra>
